<compile_context>
chip_gen: v7x
topology: tpu7x:2x2x1
jax: 0.10.0
libtpu: 0.0.40
codegen_flags: <defaults>
</compile_context>

<pallas_src>
import functools

import jax
import jax.numpy as jnp
from jax.experimental import pallas as pl
from jax.experimental.pallas import tpu as pltpu


def _round_up(x, m):
    return (x + m - 1) // m * m


def _qmlp_kernel(obs_ref, act_ref, w1o_ref, w1a_ref, b1_ref, w2_ref, b2_ref,
                 w3_ref, b3_ref, o_ref):
    # Layer 1: split-weight matmul replaces the HBM concat of [obs, act].
    h = (jnp.dot(obs_ref[...], w1o_ref[...], preferred_element_type=jnp.float32)
         + jnp.dot(act_ref[...], w1a_ref[...], preferred_element_type=jnp.float32)
         + b1_ref[...])
    h = jnp.maximum(h, 0.0)                                    # ReLU
    # Layer 2.
    h = jnp.dot(h, w2_ref[...], preferred_element_type=jnp.float32) + b2_ref[...]
    h = jnp.maximum(h, 0.0)
    # Layer 3 (h2 -> 1): VPU broadcast-multiply + XLU lane reduction instead
    # of a 1-column MXU matmul.  b3 is an SMEM scalar.
    q = jnp.sum(h * w3_ref[...], axis=-1, keepdims=True) + b3_ref[0]   # (tb, 1)
    # Lane-dense store: (tb, 1) -> (8, tb // 8); row-major order is preserved,
    # so the wrapper's flat reshape recovers the original row ordering.
    o_ref[...] = q.reshape(o_ref.shape).astype(o_ref.dtype)


@functools.partial(jax.jit, static_argnames=("batch_tile", "use_bf16"))
def qmlp_head_forward(observation, action, params, *, batch_tile=None,
                      use_bf16=False):
    """QMlpHead.forward for leading dims (T, B); returns q of shape (T, B)."""
    w1, b1, w2, b2, w3, b3 = params
    T, B = observation.shape[0], observation.shape[1]
    n = T * B

    obs_flat = observation.reshape(n, -1)
    act_flat = action.reshape(n, -1)
    d_obs = obs_flat.shape[1]
    d_act = act_flat.shape[1]
    h1 = w1.shape[1]
    h2 = w2.shape[1]
    out_dtype = observation.dtype

    # Split W1 so the [obs, act] concat never materializes in HBM:
    #   x @ W1 == obs @ W1[:d_obs] + act @ W1[d_obs:]
    w1_obs = w1[:d_obs]
    w1_act = w1[d_obs:]

    if use_bf16:
        # Halve the dominant HBM read (the activation stream); accumulation
        # stays f32 via preferred_element_type inside the kernel.
        obs_flat = obs_flat.astype(jnp.bfloat16)
        act_flat = act_flat.astype(jnp.bfloat16)
        w1_obs = w1_obs.astype(jnp.bfloat16)
        w1_act = w1_act.astype(jnp.bfloat16)

    # Row tile: big enough to amortize per-step overhead / approach the HBM
    # roofline, small enough to stay far under scoped VMEM on v5e/v6e/v7x.
    mult = 16 if use_bf16 else 8
    if batch_tile is None:
        tb = min(1024, _round_up(n, mult))
    else:
        tb = batch_tile
    tb = max(mult, _round_up(tb, mult))

    n_pad = _round_up(n, tb)
    grid_n = n_pad // tb
    if n_pad != n:
        pad = n_pad - n
        obs_flat = jnp.pad(obs_flat, ((0, pad), (0, 0)))
        act_flat = jnp.pad(act_flat, ((0, pad), (0, 0)))

    lanes = tb // 8  # lane width of each output block (128 when tb == 1024)

    b1r = b1.reshape(1, h1).astype(jnp.float32)
    b2r = b2.reshape(1, h2).astype(jnp.float32)
    w3r = w3.reshape(1, h2).astype(jnp.float32)   # row-broadcast final weight
    b3r = b3.reshape(1).astype(jnp.float32)       # SMEM scalar

    full = lambda i: (0, 0)

    q2d = pl.pallas_call(
        _qmlp_kernel,
        out_shape=jax.ShapeDtypeStruct((grid_n * 8, lanes), out_dtype),
        grid=(grid_n,),
        in_specs=[
            pl.BlockSpec((tb, d_obs), lambda i: (i, 0)),          # obs tile
            pl.BlockSpec((tb, d_act), lambda i: (i, 0)),          # act tile
            pl.BlockSpec((d_obs, h1), full),                      # W1[:d_obs]
            pl.BlockSpec((d_act, h1), full),                      # W1[d_obs:]
            pl.BlockSpec((1, h1), full),                          # b1
            pl.BlockSpec((h1, h2), full),                         # W2
            pl.BlockSpec((1, h2), full),                          # b2
            pl.BlockSpec((1, h2), full),                          # W3 row
            pl.BlockSpec(memory_space=pltpu.MemorySpace.SMEM),    # b3 scalar
        ],
        out_specs=pl.BlockSpec((8, lanes), lambda i: (i, 0)),
        compiler_params=pltpu.CompilerParams(
            dimension_semantics=("parallel",)),
    )(obs_flat, act_flat, w1_obs, w1_act, b1r, w2, b2r, w3r, b3r)

    q = q2d.reshape(n_pad)[:n]       # drop batch padding; squeeze(-1)
    return q.reshape(T, B)           # restore_leading_dims (lead_dim == 2)


def init_params(key, input_size, action_size, hidden_sizes):
    """Deterministic synthetic init of the MLP Linear layers."""
    d_in = input_size + action_size
    sizes = [d_in] + list(hidden_sizes) + [1]
    params = []
    for i in range(len(sizes) - 1):
        key, kw, kb = jax.random.split(key, 3)
        fan_in = sizes[i]
        scale = 1.0 / jnp.sqrt(jnp.float32(fan_in))
        w = jax.random.uniform(kw, (sizes[i], sizes[i + 1]),
                               jnp.float32, -scale, scale)
        b = jax.random.uniform(kb, (sizes[i + 1],), jnp.float32, -scale, scale)
        params += [w, b]
    return tuple(params)


def _reference(observation, action, params):
    w1, b1, w2, b2, w3, b3 = params
    T, B = observation.shape[0], observation.shape[1]
    x = jnp.concatenate(
        [observation.reshape(T * B, -1), action.reshape(T * B, -1)], axis=1)
    h = jnp.maximum(x @ w1 + b1, 0.0)
    h = jnp.maximum(h @ w2 + b2, 0.0)
    q = (h @ w3 + b3).squeeze(-1)
    return q.reshape(T, B)


if __name__ == "__main__":
    key = jax.random.PRNGKey(0)
    input_size, action_size = 24, 8
    hidden_sizes = (32, 32)

    k_obs, k_act, k_par, k_obs2, k_act2 = jax.random.split(key, 5)
    params = init_params(k_par, input_size, action_size, hidden_sizes)

    # Case 1: tiny (T, B) -- single tile.
    T, B = 2, 4
    observation = jax.random.normal(k_obs, (T, B, input_size), jnp.float32)
    action = jax.random.normal(k_act, (T, B, action_size), jnp.float32)
    q = jax.block_until_ready(qmlp_head_forward(observation, action, params))
    q_ref = _reference(observation, action, params)
    assert q.shape == (T, B)
    assert jnp.allclose(q, q_ref, atol=1e-5, rtol=1e-5)

    # Case 2: multi-tile grid + batch padding (n = 35 not a multiple of 16).
    T2, B2 = 5, 7
    obs2 = jax.random.normal(k_obs2, (T2, B2, input_size), jnp.float32)
    act2 = jax.random.normal(k_act2, (T2, B2, action_size), jnp.float32)
    q2 = jax.block_until_ready(
        qmlp_head_forward(obs2, act2, params, batch_tile=16))
    q2_ref = _reference(obs2, act2, params)
    assert q2.shape == (T2, B2)
    assert jnp.allclose(q2, q2_ref, atol=1e-5, rtol=1e-5)

    print("KERNEL_OK")
</pallas_src>

<mosaic_0001>
module attributes {stable_mosaic.version = 11 : i64} {
  func.func @_qmlp_kernel(%arg0: i32, %arg1: memref<8x24xf32, #tpu.memory_space<vmem>>, %arg2: memref<8x8xf32, #tpu.memory_space<vmem>>, %arg3: memref<24x32xf32, #tpu.memory_space<vmem>>, %arg4: memref<8x32xf32, #tpu.memory_space<vmem>>, %arg5: memref<1x32xf32, #tpu.memory_space<vmem>>, %arg6: memref<32x32xf32, #tpu.memory_space<vmem>>, %arg7: memref<1x32xf32, #tpu.memory_space<vmem>>, %arg8: memref<1x32xf32, #tpu.memory_space<vmem>>, %arg9: memref<1xf32, #tpu.memory_space<smem>>, %arg10: memref<8x1xf32, #tpu.memory_space<vmem>>) attributes {dimension_semantics = [#tpu.dimension_semantics<parallel>], iteration_bounds = array<i64: 1>, scalar_prefetch = 0 : i64, scratch_operands = 0 : i64, tpu.core_type = #tpu.core_type<tc>, window_params = [{transform_indices = @transform_0, window_bounds = array<i64: 8, 24>}, {transform_indices = @transform_1, window_bounds = array<i64: 8, 8>}, {pipeline_mode = #tpu.pipeline_mode<synchronous>, transform_indices = @transform_2, window_bounds = array<i64: 24, 32>}, {pipeline_mode = #tpu.pipeline_mode<synchronous>, transform_indices = @transform_3, window_bounds = array<i64: 8, 32>}, {pipeline_mode = #tpu.pipeline_mode<synchronous>, transform_indices = @transform_4, window_bounds = array<i64: 1, 32>}, {pipeline_mode = #tpu.pipeline_mode<synchronous>, transform_indices = @transform_5, window_bounds = array<i64: 32, 32>}, {pipeline_mode = #tpu.pipeline_mode<synchronous>, transform_indices = @transform_6, window_bounds = array<i64: 1, 32>}, {pipeline_mode = #tpu.pipeline_mode<synchronous>, transform_indices = @transform_7, window_bounds = array<i64: 1, 32>}, {transform_indices = @transform_8, window_bounds = array<i64: 1>}, {transform_indices = @transform_9, window_bounds = array<i64: 8, 1>}]} {
    %c0 = arith.constant 0 : index
    %c0_0 = arith.constant 0 : index
    %0 = vector.load %arg1[%c0, %c0_0] : memref<8x24xf32, #tpu.memory_space<vmem>>, vector<8x24xf32>
    %c0_1 = arith.constant 0 : index
    %c0_2 = arith.constant 0 : index
    %1 = vector.load %arg3[%c0_1, %c0_2] : memref<24x32xf32, #tpu.memory_space<vmem>>, vector<24x32xf32>
    %cst = arith.constant dense<0.000000e+00> : vector<8x32xf32>
    %2 = tpu.matmul %0, %1, %cst {dimension_numbers = #tpu.dot_dimension_numbers<[1], [0], [0], [1], [0, 0, 1, 1], [], []>} : vector<8x24xf32>, vector<24x32xf32>, vector<8x32xf32> -> vector<8x32xf32>
    %c0_3 = arith.constant 0 : index
    %c0_4 = arith.constant 0 : index
    %3 = vector.load %arg2[%c0_3, %c0_4] : memref<8x8xf32, #tpu.memory_space<vmem>>, vector<8x8xf32>
    %c0_5 = arith.constant 0 : index
    %c0_6 = arith.constant 0 : index
    %4 = vector.load %arg4[%c0_5, %c0_6] : memref<8x32xf32, #tpu.memory_space<vmem>>, vector<8x32xf32>
    %cst_7 = arith.constant dense<0.000000e+00> : vector<8x32xf32>
    %5 = tpu.matmul %3, %4, %cst_7 {dimension_numbers = #tpu.dot_dimension_numbers<[1], [0], [0], [1], [0, 0, 1, 1], [], []>} : vector<8x8xf32>, vector<8x32xf32>, vector<8x32xf32> -> vector<8x32xf32>
    %6 = arith.addf %2, %5 : vector<8x32xf32>
    %c0_8 = arith.constant 0 : index
    %c0_9 = arith.constant 0 : index
    %7 = vector.load %arg5[%c0_8, %c0_9] : memref<1x32xf32, #tpu.memory_space<vmem>>, vector<1x32xf32>
    %8 = vector.broadcast %7 : vector<1x32xf32> to vector<8x32xf32>
    %9 = arith.addf %6, %8 : vector<8x32xf32>
    %cst_10 = arith.constant 0.000000e+00 : f32
    %10 = vector.broadcast %cst_10 : f32 to vector<8x32xf32>
    %11 = arith.maximumf %9, %10 : vector<8x32xf32>
    %c0_11 = arith.constant 0 : index
    %c0_12 = arith.constant 0 : index
    %12 = vector.load %arg6[%c0_11, %c0_12] : memref<32x32xf32, #tpu.memory_space<vmem>>, vector<32x32xf32>
    %cst_13 = arith.constant dense<0.000000e+00> : vector<8x32xf32>
    %13 = tpu.matmul %11, %12, %cst_13 {dimension_numbers = #tpu.dot_dimension_numbers<[1], [0], [0], [1], [0, 0, 1, 1], [], []>} : vector<8x32xf32>, vector<32x32xf32>, vector<8x32xf32> -> vector<8x32xf32>
    %c0_14 = arith.constant 0 : index
    %c0_15 = arith.constant 0 : index
    %14 = vector.load %arg7[%c0_14, %c0_15] : memref<1x32xf32, #tpu.memory_space<vmem>>, vector<1x32xf32>
    %15 = vector.broadcast %14 : vector<1x32xf32> to vector<8x32xf32>
    %16 = arith.addf %13, %15 : vector<8x32xf32>
    %cst_16 = arith.constant 0.000000e+00 : f32
    %17 = vector.broadcast %cst_16 : f32 to vector<8x32xf32>
    %18 = arith.maximumf %16, %17 : vector<8x32xf32>
    %c0_17 = arith.constant 0 : index
    %c0_18 = arith.constant 0 : index
    %19 = vector.load %arg8[%c0_17, %c0_18] : memref<1x32xf32, #tpu.memory_space<vmem>>, vector<1x32xf32>
    %20 = vector.broadcast %19 : vector<1x32xf32> to vector<8x32xf32>
    %21 = arith.mulf %18, %20 : vector<8x32xf32>
    %cst_19 = arith.constant dense<0.000000e+00> : vector<8xf32>
    %22 = vector.multi_reduction <add>, %21, %cst_19 [1] : vector<8x32xf32> to vector<8xf32>
    %23 = vector.shape_cast %22 : vector<8xf32> to vector<8x1xf32>
    %c0_20 = arith.constant 0 : index
    %24 = memref.load %arg9[%c0_20] : memref<1xf32, #tpu.memory_space<smem>>
    %25 = vector.broadcast %24 : f32 to vector<8x1xf32>
    %26 = arith.addf %23, %25 : vector<8x1xf32>
    %c0_21 = arith.constant 0 : index
    %c0_22 = arith.constant 0 : index
    %27 = vector.load %arg10[%c0_21, %c0_22] : memref<8x1xf32, #tpu.memory_space<vmem>>, vector<8x1xf32>
    tpu.vector_store %arg10[%c0_21, %c0_22], %26 {strides = array<i32>} : memref<8x1xf32, #tpu.memory_space<vmem>>, vector<8x1xf32>,
    return
  }
  func.func @transform_0(%arg0: i32) -> (i32, i32) {
    %c0_i32 = arith.constant 0 : i32
    %c0_i32_0 = arith.constant 0 : i32
    return %arg0, %c0_i32 : i32, i32
  }
  func.func @transform_1(%arg0: i32) -> (i32, i32) {
    %c0_i32 = arith.constant 0 : i32
    %c0_i32_0 = arith.constant 0 : i32
    return %arg0, %c0_i32 : i32, i32
  }
  func.func @transform_2(%arg0: i32) -> (i32, i32) {
    %c0_i32 = arith.constant 0 : i32
    %c0_i32_0 = arith.constant 0 : i32
    %c0_i32_1 = arith.constant 0 : i32
    return %c0_i32, %c0_i32_0 : i32, i32
  }
  func.func @transform_3(%arg0: i32) -> (i32, i32) {
    %c0_i32 = arith.constant 0 : i32
    %c0_i32_0 = arith.constant 0 : i32
    %c0_i32_1 = arith.constant 0 : i32
    return %c0_i32, %c0_i32_0 : i32, i32
  }
  func.func @transform_4(%arg0: i32) -> (i32, i32) {
    %c0_i32 = arith.constant 0 : i32
    %c0_i32_0 = arith.constant 0 : i32
    %c0_i32_1 = arith.constant 0 : i32
    return %c0_i32, %c0_i32_0 : i32, i32
  }
  func.func @transform_5(%arg0: i32) -> (i32, i32) {
    %c0_i32 = arith.constant 0 : i32
    %c0_i32_0 = arith.constant 0 : i32
    %c0_i32_1 = arith.constant 0 : i32
    return %c0_i32, %c0_i32_0 : i32, i32
  }
  func.func @transform_6(%arg0: i32) -> (i32, i32) {
    %c0_i32 = arith.constant 0 : i32
    %c0_i32_0 = arith.constant 0 : i32
    %c0_i32_1 = arith.constant 0 : i32
    return %c0_i32, %c0_i32_0 : i32, i32
  }
  func.func @transform_7(%arg0: i32) -> (i32, i32) {
    %c0_i32 = arith.constant 0 : i32
    %c0_i32_0 = arith.constant 0 : i32
    %c0_i32_1 = arith.constant 0 : i32
    return %c0_i32, %c0_i32_0 : i32, i32
  }
  func.func @transform_8(%arg0: i32) -> i32 {
    %c0_i32 = arith.constant 0 : i32
    %c0_i32_0 = arith.constant 0 : i32
    return %c0_i32 : i32
  }
  func.func @transform_9(%arg0: i32) -> (i32, i32) {
    %c0_i32 = arith.constant 0 : i32
    %c0_i32_0 = arith.constant 0 : i32
    return %arg0, %c0_i32 : i32, i32
  }
}

</mosaic_0001>

<bundles_post_ra>
// kernel: qmlp_head_forward.1
= control target key start
LH: loop header
LB: loop body
LE: loop exit
PB: predicated region body
PF: predicated region fallthrough
CT: control target
= control target key end

     0   :  { %vm39_vm0 = vcmask 64512   ;;  %v356_v0 = vmov 0.0   ;;  %vm357_vm1 = vmmov 0   ;;  %v358_v5 = vmov 0.0|0.0   ;;  %s454_s3 = inlined_call_operand.vmem [shape: f32[8,32], index: 3, kind: input, shape index: {}]   ;;  %s455_s1 = inlined_call_operand.vmem [shape: f32[8,8], index: 1, kind: input, shape index: {}]   ;;  %s456_s2 = inlined_call_operand.vmem [shape: f32[24,32], index: 2, kind: input, shape index: {}]   ;;  %s457_s0 = inlined_call_operand.vmem [shape: f32[8,24], index: 0, kind: input, shape index: {}]   ;;  %s458_s5 = inlined_call_operand.vmem [shape: f32[32,32], index: 5, kind: input, shape index: {}]   ;;  %s459_s4 = inlined_call_operand.vmem [shape: f32[1,32], index: 4, kind: input, shape index: {}]   ;;  %s460_s6 = inlined_call_operand.vmem [shape: f32[1,32], index: 6, kind: input, shape index: {}]   ;;  %s461_s7 = inlined_call_operand.vmem [shape: f32[1,32], index: 7, kind: input, shape index: {}]   ;;  %s462_s8 = inlined_call_operand.<no memory space> [shape: f32[1], index: 8, kind: input, shape index: {}]   ;;  %s463_s9 = inlined_call_operand.vmem [shape: f32[8,1], index: 9, kind: output, shape index: {}]  }
   0x1   :  { %319 = vmatprep.subr.mxu1 %v356_v0  ;;  %v38_v1 = vld [vmem:[%s454_s3] sm:$0xff]  ;;  %321 = vmatprep.mubr.msk.f32.mxu1 %vm357_vm1, %v356_v0  ;;  %v35_v4 = vld [vmem:[%s456_s2 + $0x8] sm:$0xff]  ;;  %v36_v7 = vld [vmem:[%s456_s2 + $0x10] sm:$0xff]  ;;  %vm113_vm2 = vcmask 195584   ;;  %vm207_vm3 = vcmask 261120   ;;  %v294_v31 = vstv %s462_s8  ;;  %vm296_vm4 = vcmask 7168  }
   0x2   :  { %v37_v2 = vld [vmem:[%s455_s1] sm:$0xff]  ;;  %320 = vmatpush3.msra.mxu1 %v38_v1  ;;  %347 = vmatprep.subr.bf16.mxu0 %v358_v5  ;;  %v197_v10 = vld [vmem:[%s458_s5 + $0x8] sm:$0xff]  ;;  %v198_v12 = vld [vmem:[%s458_s5 + $0x10] sm:$0xff] }
   0x3   :  { %v34_v3 = vld [vmem:[%s456_s2] sm:$0xff]  ;;  %322 = vmatmul.mubr.msk.f32.vlgmr.msra.gmra.mrb[0].mxu1 %vm39_vm0, %v37_v2  ;;  %344 = vmatprep.subr.bf16.mxu1 %v358_v5  ;;  %v199_v13 = vld [vmem:[%s458_s5 + $0x18] sm:$0xff] }
   0x4   :  { %v345_v6 = vpack.c.bf16 %v35_v4, %v34_v3  ;;  %330 = vmatprep.mubr.msk.f32.mxu1 %vm357_vm1, %v356_v0  ;;  %341 = vmatprep.mubr.msk.f32.mxu0 %vm357_vm1, %v356_v0  ;;  %v33_v8 = vld [vmem:[%s457_s0] sm:$0xff]  ;;  %v351_v14 = vpack.c.bf16 %v199_v13, %v198_v12 }
   0x5   :  { %v196_v9 = vld [vmem:[%s458_s5] sm:$0xff] }
   0x6   :  { %346 = vmatpush3.bf16.msra.mxu1 %v345_v6  ;;  %v348_v11 = vpack.c.bf16 %v197_v10, %v196_v9  ;;  %v304_v18 = vld [vmem:[%s459_s4] ss:$0 sm:$0xff] }
   0x7   :  { %328 = vmatprep.subr.mxu1 %v356_v0  ;;  %v305_v23 = vld [vmem:[%s460_s6] ss:$0 sm:$0xff] }
   0x8   :  { %349 = vmatpush3.bf16.msra.mxu0 %v348_v11  ;;  %v307_v27 = vld [vmem:[%s461_s7] ss:$0 sm:$0xff] }
   0x9   :  { %350 = vmatprep.subr.bf16.mxu0 %v358_v5 }
   0xa   :  { %329 = vmatpush3.msra.mxu1 %v36_v7 }
   0xb   :  { %331 = vmatmul.mubr.msk.f32.vlgmr.msra.gmra.mrb[2].mxu1 %vm113_vm2, %v33_v8 }
   0xc   :  { %352 = vmatpush3.bf16.msra.mxu0 %v351_v14 }
  0xd6   :  { %v109_v15 = vpop.f32.mrb[0].mxu1 }
  0xd7   :  { %v323_v16 = vpop.f32.mrb[1].mxu1 }
  0xde   :  { %v183_v17 = vpop.f32.mrb[2].mxu1 }
  0xdf   :  { %v184_v19 = vadd.f32 %v183_v17, %v109_v15  ;;  %v332_v20 = vpop.f32.mrb[3].mxu1 }
  0xe1   :  { %v194_v21 = vadd.f32 %v304_v18, %v184_v19 }
  0xe3   :  { %v195_v22 = vmax.f32 %v194_v21, 0.0 }
  0xe5   :  { %342 = vmatmul.mubr.msk.f32.vlgmr.msra.gmra.mrb[0].mxu0 %vm207_vm3, %v195_v22 }
 0x1b8   :  { %v277_v24 = vpop.f32.mrb[0].mxu0 }
 0x1b9   :  { %v278_v25 = vadd.f32 %v305_v23, %v277_v24  ;;  %v343_v26 = vpop.f32.mrb[1].mxu0 }
 0x1bb   :  { %v281_v28 = vmax.f32 %v278_v25, 0.0 }
 0x1bd   :  { %v289_v29 = vmul.f32 %v307_v27, %v281_v28 }
 0x1bf   :  { %v290_v30 = vsel %vm207_vm3, %v289_v29, 0.0 }
 0x1c0   :  { %291 = vadd.xlane.f32.xlu0 %v290_v30 }
 0x24d   :  { %v292_v32 = vpop.xlane.xlu0 %291 }
 0x24e   :  { %v295_v33 = vadd.f32 %v294_v31, %v292_v32 }
 0x250   :  { %297 = vst.msk [vmem:[%s463_s9] sm:$0xff] %vm296_vm4, %v295_v33 }

</bundles_post_ra>
